<compile_context>
chip_gen: v7x
topology: tpu7x:2x2x1
jax: 0.10.0
libtpu: 0.0.40
codegen_flags: <defaults>
</compile_context>

<pallas_src>
import functools

import jax
import jax.numpy as jnp
from jax.experimental import pallas as pl
from jax.experimental.pallas import tpu as pltpu


def clip_loss_kernel(scale_ref, img_ref, img_aug_ref, txt_aug_ref, txt_hbm_ref,
                     out_ref,
                     txt_n_ref, txt_nbf_ref, col_s_ref, col_m_ref, copy_sem,
                     *, loss_thresh, batch_size, tile_b):
    eps = 1e-12  # torch.nn.functional.normalize default eps
    step = pl.program_id(0)
    lane = jax.lax.broadcasted_iota(jnp.int32, (1, 128), 1)

    def normalize(x):
        sq = jnp.sum(x * x, axis=-1, keepdims=True)
        return x * jax.lax.rsqrt(jnp.maximum(sq, eps * eps))  # == x / max(||x||, eps)

    # ---- one-time init: DMA text HBM->VMEM, normalize, bf16 copy, accumulators ----
    @pl.when(step == 0)
    def _init():
        cp = pltpu.make_async_copy(txt_hbm_ref, txt_n_ref, copy_sem)
        cp.start()
        cp.wait()
        t = normalize(txt_n_ref[...].astype(jnp.float32))
        txt_n_ref[...] = t                       # normalized f32 text (SSE path)
        txt_nbf_ref[...] = t.astype(jnp.bfloat16)  # resident MXU RHS operand
        col_s_ref[...] = jnp.zeros_like(col_s_ref)
        col_m_ref[...] = jnp.full_like(col_m_ref, -jnp.inf)
        out_ref[...] = jnp.zeros_like(out_ref)   # output block doubles as accumulator

    scale = scale_ref[...]                                          # (1, 1) f32

    img_n = normalize(img_ref[...].astype(jnp.float32))             # (tB, D)
    img_aug_n = normalize(img_aug_ref[...].astype(jnp.float32))     # (tB, D)
    txt_aug_n = normalize(txt_aug_ref[...].astype(jnp.float32))     # (tB, D)

    row0 = pl.multiple_of(step * tile_b, tile_b)
    txt_tile_n = txt_n_ref[pl.ds(row0, tile_b), :]                  # (tB, D) f32, normalized

    # Fold logit_scale into the image operand once (O(B*D), not O(B^2)).
    img_s_bf = (img_n * scale).astype(jnp.bfloat16)

    # Single bf16 MXU matmul, f32 accumulation: (tB, D) x (B, D)^T -> (tB, B)
    logits = jax.lax.dot_general(
        img_s_bf, txt_nbf_ref[...],
        dimension_numbers=(((1,), (1,)), ((), ())),
        preferred_element_type=jnp.float32)

    # Diagonal logits (labels[i] = global row id, rank 0) extracted from the
    # slab -> bit-identical to the CE numerator.
    col_ids = jax.lax.broadcasted_iota(jnp.int32, (tile_b, batch_size), 1)
    labels = row0 + jax.lax.broadcasted_iota(jnp.int32, (tile_b, 1), 0)
    diag = jnp.sum(jnp.where(col_ids == labels, logits, 0.0),
                   axis=-1, keepdims=True)                          # (tB, 1)

    # Image-side CE: exact per-row LSE.  SINGLE slab exp, reused below.
    row_max = jnp.max(logits, axis=-1, keepdims=True)               # (tB, 1)
    p = jnp.exp(logits - row_max)                                   # (tB, B)
    row_lse = jnp.log(jnp.sum(p, axis=-1, keepdims=True)) + row_max  # (tB, 1)

    # Accuracy: label column attains the row max (f32 ties are measure-zero).
    correct = (diag >= row_max).astype(jnp.float32)                 # (tB, 1)

    # Text-side CE: online column sum-exp with a running *scalar* max.
    # col_s[j] = sum over processed rows i of exp(logits[i, j] - col_m).
    tile_m = jnp.max(row_max, axis=0, keepdims=True)                # (1, 1)
    new_m = jnp.maximum(col_m_ref[...], tile_m)                     # (1, 1)
    r = jnp.exp(row_max - new_m)                                    # (tB, 1), <= 1
    col_s_ref[...] = (col_s_ref[...] * jnp.exp(col_m_ref[...] - new_m)
                      + jnp.sum(p * r, axis=0, keepdims=True))      # (1, B)
    col_m_ref[...] = new_m

    # l2(...) reduction='mean': per-row sum of squared error, /B at finalize.
    di = img_n - img_aug_n
    dt = txt_tile_n - txt_aug_n
    img_sse = jnp.sum(di * di, axis=-1, keepdims=True)              # (tB, 1)
    txt_sse = jnp.sum(dt * dt, axis=-1, keepdims=True)              # (tB, 1)

    # Accumulate the five per-tile scalars into lanes 0..4 of the resident output.
    def tot(x):
        return jnp.sum(x, axis=0, keepdims=True)                    # (1, 1)
    upd = (jnp.where(lane == 0, tot(row_lse), 0.0)
           + jnp.where(lane == 1, tot(diag), 0.0)
           + jnp.where(lane == 2, tot(correct), 0.0)
           + jnp.where(lane == 3, tot(img_sse), 0.0)
           + jnp.where(lane == 4, tot(txt_sse), 0.0))
    out_ref[...] += upd

    # ---- finalize on the last row tile ----
    @pl.when(step == pl.num_programs(0) - 1)
    def _finalize():
        bf = jnp.float32(batch_size)
        sums = out_ref[...]                                         # (1, 128)

        def lane_sum(k):
            return jnp.sum(jnp.where(lane == k, sums, 0.0), axis=-1, keepdims=True)

        row_lse_sum = lane_sum(0)
        diag_sum = lane_sum(1)
        corr = lane_sum(2)
        img_sse_sum = lane_sum(3)
        txt_sse_sum = lane_sum(4)

        col_lse = jnp.log(col_s_ref[...]) + col_m_ref[...]          # (1, B)
        col_lse_sum = jnp.sum(col_lse, axis=-1, keepdims=True)      # (1, 1)

        mean_diag = diag_sum / bf
        ce_img = row_lse_sum / bf - mean_diag
        ce_txt = col_lse_sum / bf - mean_diag
        lossclip = 0.5 * (ce_img + ce_txt)                          # (1, 1)

        img_loss = img_sse_sum / bf
        txt_loss = txt_sse_sum / bf
        # threshold_tensor(x, thresh, 0.0): values strictly greater than thresh -> 0.
        img_loss = jnp.where(img_loss > loss_thresh, 0.0, img_loss)
        txt_loss = jnp.where(txt_loss > loss_thresh, 0.0, txt_loss)
        total = lossclip - 0.5 * (img_loss + txt_loss)
        acc = 100.0 * corr / bf

        out_ref[...] = (jnp.where(lane == 0, lossclip, 0.0)
                        + jnp.where(lane == 1, acc, 0.0)
                        + jnp.where(lane == 2, total, 0.0)
                        + jnp.where(lane == 3, img_loss, 0.0)
                        + jnp.where(lane == 4, txt_loss, 0.0))


def clip_loss(image_embed, text_embed, aug_image_embed, aug_text_embed,
              logit_scale, loss_thresh):
    """Pallas implementation of CLIPLoss.forward (single-device semantics)."""
    f32 = jnp.float32
    image_embed = image_embed.astype(f32)
    text_embed = text_embed.astype(f32)
    aug_image_embed = aug_image_embed.astype(f32)
    aug_text_embed = aug_text_embed.astype(f32)
    B, D = image_embed.shape

    # Device-aware VMEM budget (v7x: 64 MiB per core; v5e/v6e: 128 MiB).
    try:
        vmem_cap = int(pltpu.get_tpu_info().vmem_capacity_bytes)
    except Exception:
        vmem_cap = 64 * 1024 * 1024   # conservative fallback
    budget = max(vmem_cap - (4 << 20), 16 << 20)

    def vmem_need(tb):
        # 3 streamed f32 inputs x2 buffers, resident f32+bf16 text, ~6 live
        # (tB,B) f32 slab temporaries, plus a small fudge for scratch/out.
        return 24 * tb * D + 6 * B * D + 24 * tb * B + (2 << 20)

    if B % 8 == 0:
        tB = 8
        for cand in (512, 256, 128, 64, 32, 16, 8):
            if cand <= B and B % cand == 0 and vmem_need(cand) <= budget:
                tB = cand
                break
    else:
        tB = B   # small/unaligned batch: single full-batch tile
    n_tiles = B // tB

    scale = jnp.reshape(jnp.asarray(logit_scale, f32), (1, 1))
    kernel = functools.partial(clip_loss_kernel, loss_thresh=float(loss_thresh),
                               batch_size=B, tile_b=tB)

    vmem_limit = int(min(max(vmem_need(tB), 32 * 1024 * 1024), budget))

    out = pl.pallas_call(
        kernel,
        out_shape=jax.ShapeDtypeStruct((1, 128), f32),
        grid=(n_tiles,),
        in_specs=[
            pl.BlockSpec((1, 1), lambda i: (0, 0)),      # logit scale
            pl.BlockSpec((tB, D), lambda i: (i, 0)),     # image tile (streamed)
            pl.BlockSpec((tB, D), lambda i: (i, 0)),     # aug image tile (streamed)
            pl.BlockSpec((tB, D), lambda i: (i, 0)),     # aug text tile (streamed)
            pl.BlockSpec(memory_space=pl.ANY),           # full text: stays in HBM
        ],
        out_specs=pl.BlockSpec((1, 128), lambda i: (0, 0)),
        scratch_shapes=[
            pltpu.VMEM((B, D), f32),            # normalized f32 text (SSE path)
            pltpu.VMEM((B, D), jnp.bfloat16),   # normalized bf16 text (MXU RHS)
            pltpu.VMEM((1, B), f32),            # online column sum-exp
            pltpu.VMEM((1, 1), f32),            # running scalar max
            pltpu.SemaphoreType.DMA,            # init HBM->VMEM text copy
        ],
        compiler_params=pltpu.CompilerParams(
            dimension_semantics=("arbitrary",),
            vmem_limit_bytes=vmem_limit),
    )(scale, image_embed, aug_image_embed, aug_text_embed, text_embed)

    vec = out[0]
    return {
        'clip-loss': vec[0],
        'clip_acc': vec[1],
        'total-loss': vec[2],
        'img-loss': vec[3],
        'text-loss': vec[4],
    }


if __name__ == "__main__":
    key = jax.random.PRNGKey(0)
    B, D = 8, 128  # small batch, feature dim lane-aligned
    k1, k2, k3, k4 = jax.random.split(key, 4)
    clean_image_embed = jax.random.normal(k1, (B, D), jnp.float32)
    text_embed = jax.random.normal(k2, (B, D), jnp.float32)
    aug_image_embed = clean_image_embed + 0.05 * jax.random.normal(k3, (B, D), jnp.float32)
    aug_text_embed = text_embed + 0.05 * jax.random.normal(k4, (B, D), jnp.float32)
    logit_scale = jnp.float32(1.0 / 0.07)   # typical CLIP exp(logit_scale)
    loss_thresh = 0.5

    out = clip_loss(clean_image_embed, text_embed, aug_image_embed,
                    aug_text_embed, logit_scale, loss_thresh)
    jax.block_until_ready(out)
    print("KERNEL_OK")
</pallas_src>

<mosaic_0001>
module attributes {stable_mosaic.version = 11 : i64} {
  func.func @clip_loss_kernel(%arg0: i32, %arg1: memref<1x1xf32, #tpu.memory_space<vmem>>, %arg2: memref<8x128xf32, #tpu.memory_space<vmem>>, %arg3: memref<8x128xf32, #tpu.memory_space<vmem>>, %arg4: memref<8x128xf32, #tpu.memory_space<vmem>>, %arg5: memref<8x128xf32, #tpu.memory_space<any>>, %arg6: memref<1x128xf32, #tpu.memory_space<vmem>>, %arg7: memref<8x128xf32, #tpu.memory_space<vmem>>, %arg8: memref<8x128xbf16, #tpu.memory_space<vmem>>, %arg9: memref<1x8xf32, #tpu.memory_space<vmem>>, %arg10: memref<1x1xf32, #tpu.memory_space<vmem>>, %arg11: memref<!tpu.dma_semaphore, #tpu.memory_space<semaphore_mem>>) attributes {dimension_semantics = [#tpu.dimension_semantics<arbitrary>], iteration_bounds = array<i64: 1>, scalar_prefetch = 0 : i64, scratch_operands = 5 : i64, tpu.core_type = #tpu.core_type<tc>, window_params = [{pipeline_mode = #tpu.pipeline_mode<synchronous>, transform_indices = @transform_0, window_bounds = array<i64: 1, 1>}, {transform_indices = @transform_1, window_bounds = array<i64: 8, 128>}, {transform_indices = @transform_2, window_bounds = array<i64: 8, 128>}, {transform_indices = @transform_3, window_bounds = array<i64: 8, 128>}, {}, {pipeline_mode = #tpu.pipeline_mode<synchronous>, transform_indices = @transform_5, window_bounds = array<i64: 1, 128>}]} {
    %0 = tpu.iota {dimensions = array<i32: 1>} : vector<1x128xi32>
    %c0_i32 = arith.constant 0 : i32
    %1 = arith.cmpi eq, %arg0, %c0_i32 : i32
    %2 = arith.extui %1 : i1 to i32
    %c0_i32_0 = arith.constant 0 : i32
    %3 = arith.cmpi ne, %2, %c0_i32_0 : i32
    scf.if %3 {
      tpu.enqueue_dma source(%arg5 : memref<8x128xf32, #tpu.memory_space<any>>) target(%arg7 : memref<8x128xf32, #tpu.memory_space<vmem>>) target_semaphore(%arg11 : memref<!tpu.dma_semaphore, #tpu.memory_space<semaphore_mem>>)
      tpu.wait_dma2 semaphore(%arg11 : memref<!tpu.dma_semaphore, #tpu.memory_space<semaphore_mem>>) src(%arg5 : memref<8x128xf32, #tpu.memory_space<any>>) dst(%arg7 : memref<8x128xf32, #tpu.memory_space<vmem>>)
      %c0_52 = arith.constant 0 : index
      %c0_53 = arith.constant 0 : index
      %141 = vector.load %arg7[%c0_52, %c0_53] : memref<8x128xf32, #tpu.memory_space<vmem>>, vector<8x128xf32>
      %142 = arith.mulf %141, %141 : vector<8x128xf32>
      %cst_54 = arith.constant dense<0.000000e+00> : vector<8xf32>
      %143 = vector.multi_reduction <add>, %142, %cst_54 [1] : vector<8x128xf32> to vector<8xf32>
      %144 = vector.shape_cast %143 : vector<8xf32> to vector<8x1xf32>
      %cst_55 = arith.constant 1.000000e-24 : f32
      %145 = vector.broadcast %cst_55 : f32 to vector<8x1xf32>
      %146 = arith.maximumf %144, %145 : vector<8x1xf32>
      %147 = math.rsqrt %146 : vector<8x1xf32>
      %148 = vector.broadcast %147 : vector<8x1xf32> to vector<8x128xf32>
      %149 = arith.mulf %141, %148 : vector<8x128xf32>
      %c0_56 = arith.constant 0 : index
      %c0_57 = arith.constant 0 : index
      %150 = vector.load %arg7[%c0_56, %c0_57] : memref<8x128xf32, #tpu.memory_space<vmem>>, vector<8x128xf32>
      tpu.vector_store %arg7[%c0_56, %c0_57], %149 {strides = array<i32>} : memref<8x128xf32, #tpu.memory_space<vmem>>, vector<8x128xf32>,
      %151 = arith.truncf %149 : vector<8x128xf32> to vector<8x128xbf16>
      %c0_58 = arith.constant 0 : index
      %c0_59 = arith.constant 0 : index
      %152 = vector.load %arg8[%c0_58, %c0_59] : memref<8x128xbf16, #tpu.memory_space<vmem>>, vector<8x128xbf16>
      tpu.vector_store %arg8[%c0_58, %c0_59], %151 {strides = array<i32>} : memref<8x128xbf16, #tpu.memory_space<vmem>>, vector<8x128xbf16>,
      %cst_60 = arith.constant 0.000000e+00 : f32
      %153 = vector.broadcast %cst_60 : f32 to vector<1x8xf32>
      %c0_61 = arith.constant 0 : index
      %c0_62 = arith.constant 0 : index
      %154 = vector.load %arg9[%c0_61, %c0_62] : memref<1x8xf32, #tpu.memory_space<vmem>>, vector<1x8xf32>
      tpu.vector_store %arg9[%c0_61, %c0_62], %153 {strides = array<i32>} : memref<1x8xf32, #tpu.memory_space<vmem>>, vector<1x8xf32>,
      %cst_63 = arith.constant 0xFF800000 : f32
      %155 = vector.broadcast %cst_63 : f32 to vector<1x1xf32>
      %c0_64 = arith.constant 0 : index
      %c0_65 = arith.constant 0 : index
      %156 = vector.load %arg10[%c0_64, %c0_65] : memref<1x1xf32, #tpu.memory_space<vmem>>, vector<1x1xf32>
      tpu.vector_store %arg10[%c0_64, %c0_65], %155 {strides = array<i32>} : memref<1x1xf32, #tpu.memory_space<vmem>>, vector<1x1xf32>,
      %cst_66 = arith.constant 0.000000e+00 : f32
      %157 = vector.broadcast %cst_66 : f32 to vector<1x128xf32>
      %c0_67 = arith.constant 0 : index
      %c0_68 = arith.constant 0 : index
      %158 = vector.load %arg6[%c0_67, %c0_68] : memref<1x128xf32, #tpu.memory_space<vmem>>, vector<1x128xf32>
      tpu.vector_store %arg6[%c0_67, %c0_68], %157 {strides = array<i32>} : memref<1x128xf32, #tpu.memory_space<vmem>>, vector<1x128xf32>,
    } else {
    }
    %c0 = arith.constant 0 : index
    %c0_1 = arith.constant 0 : index
    %4 = vector.load %arg1[%c0, %c0_1] : memref<1x1xf32, #tpu.memory_space<vmem>>, vector<1x1xf32>
    %c0_2 = arith.constant 0 : index
    %c0_3 = arith.constant 0 : index
    %5 = vector.load %arg2[%c0_2, %c0_3] : memref<8x128xf32, #tpu.memory_space<vmem>>, vector<8x128xf32>
    %6 = arith.mulf %5, %5 : vector<8x128xf32>
    %cst = arith.constant dense<0.000000e+00> : vector<8xf32>
    %7 = vector.multi_reduction <add>, %6, %cst [1] : vector<8x128xf32> to vector<8xf32>
    %8 = vector.shape_cast %7 : vector<8xf32> to vector<8x1xf32>
    %cst_4 = arith.constant 1.000000e-24 : f32
    %9 = vector.broadcast %cst_4 : f32 to vector<8x1xf32>
    %10 = arith.maximumf %8, %9 : vector<8x1xf32>
    %11 = math.rsqrt %10 : vector<8x1xf32>
    %12 = vector.broadcast %11 : vector<8x1xf32> to vector<8x128xf32>
    %13 = arith.mulf %5, %12 : vector<8x128xf32>
    %c0_5 = arith.constant 0 : index
    %c0_6 = arith.constant 0 : index
    %14 = vector.load %arg3[%c0_5, %c0_6] : memref<8x128xf32, #tpu.memory_space<vmem>>, vector<8x128xf32>
    %15 = arith.mulf %14, %14 : vector<8x128xf32>
    %cst_7 = arith.constant dense<0.000000e+00> : vector<8xf32>
    %16 = vector.multi_reduction <add>, %15, %cst_7 [1] : vector<8x128xf32> to vector<8xf32>
    %17 = vector.shape_cast %16 : vector<8xf32> to vector<8x1xf32>
    %cst_8 = arith.constant 1.000000e-24 : f32
    %18 = vector.broadcast %cst_8 : f32 to vector<8x1xf32>
    %19 = arith.maximumf %17, %18 : vector<8x1xf32>
    %20 = math.rsqrt %19 : vector<8x1xf32>
    %21 = vector.broadcast %20 : vector<8x1xf32> to vector<8x128xf32>
    %22 = arith.mulf %14, %21 : vector<8x128xf32>
    %c0_9 = arith.constant 0 : index
    %c0_10 = arith.constant 0 : index
    %23 = vector.load %arg4[%c0_9, %c0_10] : memref<8x128xf32, #tpu.memory_space<vmem>>, vector<8x128xf32>
    %24 = arith.mulf %23, %23 : vector<8x128xf32>
    %cst_11 = arith.constant dense<0.000000e+00> : vector<8xf32>
    %25 = vector.multi_reduction <add>, %24, %cst_11 [1] : vector<8x128xf32> to vector<8xf32>
    %26 = vector.shape_cast %25 : vector<8xf32> to vector<8x1xf32>
    %cst_12 = arith.constant 1.000000e-24 : f32
    %27 = vector.broadcast %cst_12 : f32 to vector<8x1xf32>
    %28 = arith.maximumf %26, %27 : vector<8x1xf32>
    %29 = math.rsqrt %28 : vector<8x1xf32>
    %30 = vector.broadcast %29 : vector<8x1xf32> to vector<8x128xf32>
    %31 = arith.mulf %23, %30 : vector<8x128xf32>
    %c8_i32 = arith.constant 8 : i32
    %32 = arith.muli %arg0, %c8_i32 : i32
    %33 = tpu.assume_multiple %32, 8 : i32
    %34 = arith.index_cast %33 : i32 to index
    %c0_13 = arith.constant 0 : index
    %35 = vector.load %arg7[%34, %c0_13] : memref<8x128xf32, #tpu.memory_space<vmem>>, vector<8x128xf32>
    %36 = vector.broadcast %4 : vector<1x1xf32> to vector<8x128xf32>
    %37 = arith.mulf %13, %36 : vector<8x128xf32>
    %38 = arith.truncf %37 : vector<8x128xf32> to vector<8x128xbf16>
    %c0_14 = arith.constant 0 : index
    %c0_15 = arith.constant 0 : index
    %39 = vector.load %arg8[%c0_14, %c0_15] : memref<8x128xbf16, #tpu.memory_space<vmem>>, vector<8x128xbf16>
    %cst_16 = arith.constant dense<0.000000e+00> : vector<8x8xf32>
    %40 = tpu.matmul %38, %39, %cst_16 {dimension_numbers = #tpu.dot_dimension_numbers<[1], [1], [0], [0], [0, 0, 1, 0], [], []>} : vector<8x128xbf16>, vector<8x128xbf16>, vector<8x8xf32> -> vector<8x8xf32>
    %41 = tpu.iota {dimensions = array<i32: 1>} : vector<8x8xi32>
    %42 = tpu.iota {dimensions = array<i32: 0>} : vector<8x1xi32>
    %43 = vector.broadcast %33 : i32 to vector<8x1xi32>
    %44 = arith.addi %43, %42 : vector<8x1xi32>
    %45 = vector.broadcast %44 : vector<8x1xi32> to vector<8x8xi32>
    %46 = arith.cmpi eq, %41, %45 : vector<8x8xi32>
    %cst_17 = arith.constant 0.000000e+00 : f32
    %47 = vector.broadcast %cst_17 : f32 to vector<8x8xf32>
    %48 = arith.select %46, %40, %47 : vector<8x8xi1>, vector<8x8xf32>
    %cst_18 = arith.constant dense<0.000000e+00> : vector<8xf32>
    %49 = vector.multi_reduction <add>, %48, %cst_18 [1] : vector<8x8xf32> to vector<8xf32>
    %50 = vector.shape_cast %49 : vector<8xf32> to vector<8x1xf32>
    %cst_19 = arith.constant dense<0xFF800000> : vector<8xf32>
    %51 = vector.multi_reduction <maximumf>, %40, %cst_19 [1] : vector<8x8xf32> to vector<8xf32>
    %52 = vector.shape_cast %51 : vector<8xf32> to vector<8x1xf32>
    %53 = vector.broadcast %52 : vector<8x1xf32> to vector<8x8xf32>
    %54 = arith.subf %40, %53 : vector<8x8xf32>
    %55 = math.exp %54 : vector<8x8xf32>
    %cst_20 = arith.constant dense<0.000000e+00> : vector<8xf32>
    %56 = vector.multi_reduction <add>, %55, %cst_20 [1] : vector<8x8xf32> to vector<8xf32>
    %57 = vector.shape_cast %56 : vector<8xf32> to vector<8x1xf32>
    %58 = math.log %57 : vector<8x1xf32>
    %59 = arith.addf %58, %52 : vector<8x1xf32>
    %60 = arith.cmpf oge, %50, %52 : vector<8x1xf32>
    %61 = arith.extui %60 : vector<8x1xi1> to vector<8x1xi32>
    %62 = arith.sitofp %61 : vector<8x1xi32> to vector<8x1xf32>
    %cst_21 = arith.constant dense<0xFF800000> : vector<1xf32>
    %63 = vector.multi_reduction <maximumf>, %52, %cst_21 [0] : vector<8x1xf32> to vector<1xf32>
    %64 = vector.shape_cast %63 : vector<1xf32> to vector<1x1xf32>
    %c0_22 = arith.constant 0 : index
    %c0_23 = arith.constant 0 : index
    %65 = vector.load %arg10[%c0_22, %c0_23] : memref<1x1xf32, #tpu.memory_space<vmem>>, vector<1x1xf32>
    %66 = arith.maximumf %65, %64 : vector<1x1xf32>
    %67 = vector.broadcast %66 : vector<1x1xf32> to vector<8x1xf32>
    %68 = arith.subf %52, %67 : vector<8x1xf32>
    %69 = math.exp %68 : vector<8x1xf32>
    %c0_24 = arith.constant 0 : index
    %c0_25 = arith.constant 0 : index
    %70 = vector.load %arg9[%c0_24, %c0_25] : memref<1x8xf32, #tpu.memory_space<vmem>>, vector<1x8xf32>
    %c0_26 = arith.constant 0 : index
    %c0_27 = arith.constant 0 : index
    %71 = vector.load %arg10[%c0_26, %c0_27] : memref<1x1xf32, #tpu.memory_space<vmem>>, vector<1x1xf32>
    %72 = arith.subf %71, %66 : vector<1x1xf32>
    %73 = math.exp %72 : vector<1x1xf32>
    %74 = vector.broadcast %73 : vector<1x1xf32> to vector<1x8xf32>
    %75 = arith.mulf %70, %74 : vector<1x8xf32>
    %76 = vector.broadcast %69 : vector<8x1xf32> to vector<8x8xf32>
    %77 = arith.mulf %55, %76 : vector<8x8xf32>
    %cst_28 = arith.constant dense<0.000000e+00> : vector<8xf32>
    %78 = vector.multi_reduction <add>, %77, %cst_28 [0] : vector<8x8xf32> to vector<8xf32>
    %79 = vector.shape_cast %78 : vector<8xf32> to vector<1x8xf32>
    %80 = arith.addf %75, %79 : vector<1x8xf32>
    %c0_29 = arith.constant 0 : index
    %c0_30 = arith.constant 0 : index
    %81 = vector.load %arg9[%c0_29, %c0_30] : memref<1x8xf32, #tpu.memory_space<vmem>>, vector<1x8xf32>
    tpu.vector_store %arg9[%c0_29, %c0_30], %80 {strides = array<i32>} : memref<1x8xf32, #tpu.memory_space<vmem>>, vector<1x8xf32>,
    %c0_31 = arith.constant 0 : index
    %c0_32 = arith.constant 0 : index
    %82 = vector.load %arg10[%c0_31, %c0_32] : memref<1x1xf32, #tpu.memory_space<vmem>>, vector<1x1xf32>
    tpu.vector_store %arg10[%c0_31, %c0_32], %66 {strides = array<i32>} : memref<1x1xf32, #tpu.memory_space<vmem>>, vector<1x1xf32>,
    %83 = arith.subf %13, %22 : vector<8x128xf32>
    %84 = arith.subf %35, %31 : vector<8x128xf32>
    %85 = arith.mulf %83, %83 : vector<8x128xf32>
    %cst_33 = arith.constant dense<0.000000e+00> : vector<8xf32>
    %86 = vector.multi_reduction <add>, %85, %cst_33 [1] : vector<8x128xf32> to vector<8xf32>
    %87 = vector.shape_cast %86 : vector<8xf32> to vector<8x1xf32>
    %88 = arith.mulf %84, %84 : vector<8x128xf32>
    %cst_34 = arith.constant dense<0.000000e+00> : vector<8xf32>
    %89 = vector.multi_reduction <add>, %88, %cst_34 [1] : vector<8x128xf32> to vector<8xf32>
    %90 = vector.shape_cast %89 : vector<8xf32> to vector<8x1xf32>
    %c0_i32_35 = arith.constant 0 : i32
    %91 = vector.broadcast %c0_i32_35 : i32 to vector<1x128xi32>
    %92 = arith.cmpi eq, %0, %91 : vector<1x128xi32>
    %cst_36 = arith.constant dense<0.000000e+00> : vector<1xf32>
    %93 = vector.multi_reduction <add>, %59, %cst_36 [0] : vector<8x1xf32> to vector<1xf32>
    %94 = vector.shape_cast %93 : vector<1xf32> to vector<1x1xf32>
    %cst_37 = arith.constant 0.000000e+00 : f32
    %95 = vector.shape_cast %94 : vector<1x1xf32> to vector<1x1xf32>
    %96 = vector.broadcast %95 : vector<1x1xf32> to vector<1x128xf32>
    %97 = vector.broadcast %cst_37 : f32 to vector<1x128xf32>
    %98 = arith.select %92, %96, %97 : vector<1x128xi1>, vector<1x128xf32>
    %c1_i32 = arith.constant 1 : i32
    %99 = vector.broadcast %c1_i32 : i32 to vector<1x128xi32>
    %100 = arith.cmpi eq, %0, %99 : vector<1x128xi32>
    %cst_38 = arith.constant dense<0.000000e+00> : vector<1xf32>
    %101 = vector.multi_reduction <add>, %50, %cst_38 [0] : vector<8x1xf32> to vector<1xf32>
    %102 = vector.shape_cast %101 : vector<1xf32> to vector<1x1xf32>
    %cst_39 = arith.constant 0.000000e+00 : f32
    %103 = vector.shape_cast %102 : vector<1x1xf32> to vector<1x1xf32>
    %104 = vector.broadcast %103 : vector<1x1xf32> to vector<1x128xf32>
    %105 = vector.broadcast %cst_39 : f32 to vector<1x128xf32>
    %106 = arith.select %100, %104, %105 : vector<1x128xi1>, vector<1x128xf32>
    %107 = arith.addf %98, %106 : vector<1x128xf32>
    %c2_i32 = arith.constant 2 : i32
    %108 = vector.broadcast %c2_i32 : i32 to vector<1x128xi32>
    %109 = arith.cmpi eq, %0, %108 : vector<1x128xi32>
    %cst_40 = arith.constant dense<0.000000e+00> : vector<1xf32>
    %110 = vector.multi_reduction <add>, %62, %cst_40 [0] : vector<8x1xf32> to vector<1xf32>
    %111 = vector.shape_cast %110 : vector<1xf32> to vector<1x1xf32>
    %cst_41 = arith.constant 0.000000e+00 : f32
    %112 = vector.shape_cast %111 : vector<1x1xf32> to vector<1x1xf32>
    %113 = vector.broadcast %112 : vector<1x1xf32> to vector<1x128xf32>
    %114 = vector.broadcast %cst_41 : f32 to vector<1x128xf32>
    %115 = arith.select %109, %113, %114 : vector<1x128xi1>, vector<1x128xf32>
    %116 = arith.addf %107, %115 : vector<1x128xf32>
    %c3_i32 = arith.constant 3 : i32
    %117 = vector.broadcast %c3_i32 : i32 to vector<1x128xi32>
    %118 = arith.cmpi eq, %0, %117 : vector<1x128xi32>
    %cst_42 = arith.constant dense<0.000000e+00> : vector<1xf32>
    %119 = vector.multi_reduction <add>, %87, %cst_42 [0] : vector<8x1xf32> to vector<1xf32>
    %120 = vector.shape_cast %119 : vector<1xf32> to vector<1x1xf32>
    %cst_43 = arith.constant 0.000000e+00 : f32
    %121 = vector.shape_cast %120 : vector<1x1xf32> to vector<1x1xf32>
    %122 = vector.broadcast %121 : vector<1x1xf32> to vector<1x128xf32>
    %123 = vector.broadcast %cst_43 : f32 to vector<1x128xf32>
    %124 = arith.select %118, %122, %123 : vector<1x128xi1>, vector<1x128xf32>
    %125 = arith.addf %116, %124 : vector<1x128xf32>
    %c4_i32 = arith.constant 4 : i32
    %126 = vector.broadcast %c4_i32 : i32 to vector<1x128xi32>
    %127 = arith.cmpi eq, %0, %126 : vector<1x128xi32>
    %cst_44 = arith.constant dense<0.000000e+00> : vector<1xf32>
    %128 = vector.multi_reduction <add>, %90, %cst_44 [0] : vector<8x1xf32> to vector<1xf32>
    %129 = vector.shape_cast %128 : vector<1xf32> to vector<1x1xf32>
    %cst_45 = arith.constant 0.000000e+00 : f32
    %130 = vector.shape_cast %129 : vector<1x1xf32> to vector<1x1xf32>
    %131 = vector.broadcast %130 : vector<1x1xf32> to vector<1x128xf32>
    %132 = vector.broadcast %cst_45 : f32 to vector<1x128xf32>
    %133 = arith.select %127, %131, %132 : vector<1x128xi1>, vector<1x128xf32>
    %134 = arith.addf %125, %133 : vector<1x128xf32>
    %c0_46 = arith.constant 0 : index
    %c0_47 = arith.constant 0 : index
    %135 = vector.load %arg6[%c0_46, %c0_47] : memref<1x128xf32, #tpu.memory_space<vmem>>, vector<1x128xf32>
    %136 = arith.addf %135, %134 : vector<1x128xf32>
    %c0_48 = arith.constant 0 : index
    %c0_49 = arith.constant 0 : index
    %137 = vector.load %arg6[%c0_48, %c0_49] : memref<1x128xf32, #tpu.memory_space<vmem>>, vector<1x128xf32>
    tpu.vector_store %arg6[%c0_48, %c0_49], %136 {strides = array<i32>} : memref<1x128xf32, #tpu.memory_space<vmem>>, vector<1x128xf32>,
    %c0_i32_50 = arith.constant 0 : i32
    %138 = arith.cmpi eq, %arg0, %c0_i32_50 : i32
    %139 = arith.extui %138 : i1 to i32
    %c0_i32_51 = arith.constant 0 : i32
    %140 = arith.cmpi ne, %139, %c0_i32_51 : i32
    scf.if %140 {
      %c0_52 = arith.constant 0 : index
      %c0_53 = arith.constant 0 : index
      %141 = vector.load %arg6[%c0_52, %c0_53] : memref<1x128xf32, #tpu.memory_space<vmem>>, vector<1x128xf32>
      %c0_i32_54 = arith.constant 0 : i32
      %142 = vector.broadcast %c0_i32_54 : i32 to vector<1x128xi32>
      %143 = arith.cmpi eq, %0, %142 : vector<1x128xi32>
      %cst_55 = arith.constant 0.000000e+00 : f32
      %144 = vector.broadcast %cst_55 : f32 to vector<1x128xf32>
      %145 = arith.select %143, %141, %144 : vector<1x128xi1>, vector<1x128xf32>
      %cst_56 = arith.constant dense<0.000000e+00> : vector<1xf32>
      %146 = vector.multi_reduction <add>, %145, %cst_56 [1] : vector<1x128xf32> to vector<1xf32>
      %147 = vector.shape_cast %146 : vector<1xf32> to vector<1x1xf32>
      %c1_i32_57 = arith.constant 1 : i32
      %148 = vector.broadcast %c1_i32_57 : i32 to vector<1x128xi32>
      %149 = arith.cmpi eq, %0, %148 : vector<1x128xi32>
      %cst_58 = arith.constant 0.000000e+00 : f32
      %150 = vector.broadcast %cst_58 : f32 to vector<1x128xf32>
      %151 = arith.select %149, %141, %150 : vector<1x128xi1>, vector<1x128xf32>
      %cst_59 = arith.constant dense<0.000000e+00> : vector<1xf32>
      %152 = vector.multi_reduction <add>, %151, %cst_59 [1] : vector<1x128xf32> to vector<1xf32>
      %153 = vector.shape_cast %152 : vector<1xf32> to vector<1x1xf32>
      %c2_i32_60 = arith.constant 2 : i32
      %154 = vector.broadcast %c2_i32_60 : i32 to vector<1x128xi32>
      %155 = arith.cmpi eq, %0, %154 : vector<1x128xi32>
      %cst_61 = arith.constant 0.000000e+00 : f32
      %156 = vector.broadcast %cst_61 : f32 to vector<1x128xf32>
      %157 = arith.select %155, %141, %156 : vector<1x128xi1>, vector<1x128xf32>
      %cst_62 = arith.constant dense<0.000000e+00> : vector<1xf32>
      %158 = vector.multi_reduction <add>, %157, %cst_62 [1] : vector<1x128xf32> to vector<1xf32>
      %159 = vector.shape_cast %158 : vector<1xf32> to vector<1x1xf32>
      %c3_i32_63 = arith.constant 3 : i32
      %160 = vector.broadcast %c3_i32_63 : i32 to vector<1x128xi32>
      %161 = arith.cmpi eq, %0, %160 : vector<1x128xi32>
      %cst_64 = arith.constant 0.000000e+00 : f32
      %162 = vector.broadcast %cst_64 : f32 to vector<1x128xf32>
      %163 = arith.select %161, %141, %162 : vector<1x128xi1>, vector<1x128xf32>
      %cst_65 = arith.constant dense<0.000000e+00> : vector<1xf32>
      %164 = vector.multi_reduction <add>, %163, %cst_65 [1] : vector<1x128xf32> to vector<1xf32>
      %165 = vector.shape_cast %164 : vector<1xf32> to vector<1x1xf32>
      %c4_i32_66 = arith.constant 4 : i32
      %166 = vector.broadcast %c4_i32_66 : i32 to vector<1x128xi32>
      %167 = arith.cmpi eq, %0, %166 : vector<1x128xi32>
      %cst_67 = arith.constant 0.000000e+00 : f32
      %168 = vector.broadcast %cst_67 : f32 to vector<1x128xf32>
      %169 = arith.select %167, %141, %168 : vector<1x128xi1>, vector<1x128xf32>
      %cst_68 = arith.constant dense<0.000000e+00> : vector<1xf32>
      %170 = vector.multi_reduction <add>, %169, %cst_68 [1] : vector<1x128xf32> to vector<1xf32>
      %171 = vector.shape_cast %170 : vector<1xf32> to vector<1x1xf32>
      %c0_69 = arith.constant 0 : index
      %c0_70 = arith.constant 0 : index
      %172 = vector.load %arg9[%c0_69, %c0_70] : memref<1x8xf32, #tpu.memory_space<vmem>>, vector<1x8xf32>
      %173 = math.log %172 : vector<1x8xf32>
      %c0_71 = arith.constant 0 : index
      %c0_72 = arith.constant 0 : index
      %174 = vector.load %arg10[%c0_71, %c0_72] : memref<1x1xf32, #tpu.memory_space<vmem>>, vector<1x1xf32>
      %175 = vector.broadcast %174 : vector<1x1xf32> to vector<1x8xf32>
      %176 = arith.addf %173, %175 : vector<1x8xf32>
      %cst_73 = arith.constant dense<0.000000e+00> : vector<1xf32>
      %177 = vector.multi_reduction <add>, %176, %cst_73 [1] : vector<1x8xf32> to vector<1xf32>
      %178 = vector.shape_cast %177 : vector<1xf32> to vector<1x1xf32>
      %cst_74 = arith.constant 8.000000e+00 : f32
      %179 = vector.broadcast %cst_74 : f32 to vector<1x1xf32>
      %180 = arith.divf %153, %179 : vector<1x1xf32>
      %cst_75 = arith.constant 8.000000e+00 : f32
      %181 = vector.broadcast %cst_75 : f32 to vector<1x1xf32>
      %182 = arith.divf %147, %181 : vector<1x1xf32>
      %183 = arith.subf %182, %180 : vector<1x1xf32>
      %cst_76 = arith.constant 8.000000e+00 : f32
      %184 = vector.broadcast %cst_76 : f32 to vector<1x1xf32>
      %185 = arith.divf %178, %184 : vector<1x1xf32>
      %186 = arith.subf %185, %180 : vector<1x1xf32>
      %187 = arith.addf %183, %186 : vector<1x1xf32>
      %cst_77 = arith.constant 5.000000e-01 : f32
      %188 = vector.broadcast %cst_77 : f32 to vector<1x1xf32>
      %189 = arith.mulf %188, %187 : vector<1x1xf32>
      %cst_78 = arith.constant 8.000000e+00 : f32
      %190 = vector.broadcast %cst_78 : f32 to vector<1x1xf32>
      %191 = arith.divf %165, %190 : vector<1x1xf32>
      %cst_79 = arith.constant 8.000000e+00 : f32
      %192 = vector.broadcast %cst_79 : f32 to vector<1x1xf32>
      %193 = arith.divf %171, %192 : vector<1x1xf32>
      %cst_80 = arith.constant 5.000000e-01 : f32
      %194 = vector.broadcast %cst_80 : f32 to vector<1x1xf32>
      %195 = arith.cmpf ogt, %191, %194 : vector<1x1xf32>
      %cst_81 = arith.constant 0.000000e+00 : f32
      %196 = vector.broadcast %cst_81 : f32 to vector<1x1xf32>
      %197 = arith.select %195, %196, %191 : vector<1x1xi1>, vector<1x1xf32>
      %cst_82 = arith.constant 5.000000e-01 : f32
      %198 = vector.broadcast %cst_82 : f32 to vector<1x1xf32>
      %199 = arith.cmpf ogt, %193, %198 : vector<1x1xf32>
      %cst_83 = arith.constant 0.000000e+00 : f32
      %200 = vector.broadcast %cst_83 : f32 to vector<1x1xf32>
      %201 = arith.select %199, %200, %193 : vector<1x1xi1>, vector<1x1xf32>
      %202 = arith.addf %197, %201 : vector<1x1xf32>
      %cst_84 = arith.constant 5.000000e-01 : f32
      %203 = vector.broadcast %cst_84 : f32 to vector<1x1xf32>
      %204 = arith.mulf %203, %202 : vector<1x1xf32>
      %205 = arith.subf %189, %204 : vector<1x1xf32>
      %cst_85 = arith.constant 1.000000e+02 : f32
      %206 = vector.broadcast %cst_85 : f32 to vector<1x1xf32>
      %207 = arith.mulf %206, %159 : vector<1x1xf32>
      %cst_86 = arith.constant 8.000000e+00 : f32
      %208 = vector.broadcast %cst_86 : f32 to vector<1x1xf32>
      %209 = arith.divf %207, %208 : vector<1x1xf32>
      %c0_i32_87 = arith.constant 0 : i32
      %210 = vector.broadcast %c0_i32_87 : i32 to vector<1x128xi32>
      %211 = arith.cmpi eq, %0, %210 : vector<1x128xi32>
      %cst_88 = arith.constant 0.000000e+00 : f32
      %212 = vector.shape_cast %189 : vector<1x1xf32> to vector<1x1xf32>
      %213 = vector.broadcast %212 : vector<1x1xf32> to vector<1x128xf32>
      %214 = vector.broadcast %cst_88 : f32 to vector<1x128xf32>
      %215 = arith.select %211, %213, %214 : vector<1x128xi1>, vector<1x128xf32>
      %c1_i32_89 = arith.constant 1 : i32
      %216 = vector.broadcast %c1_i32_89 : i32 to vector<1x128xi32>
      %217 = arith.cmpi eq, %0, %216 : vector<1x128xi32>
      %cst_90 = arith.constant 0.000000e+00 : f32
      %218 = vector.shape_cast %209 : vector<1x1xf32> to vector<1x1xf32>
      %219 = vector.broadcast %218 : vector<1x1xf32> to vector<1x128xf32>
      %220 = vector.broadcast %cst_90 : f32 to vector<1x128xf32>
      %221 = arith.select %217, %219, %220 : vector<1x128xi1>, vector<1x128xf32>
      %222 = arith.addf %215, %221 : vector<1x128xf32>
      %c2_i32_91 = arith.constant 2 : i32
      %223 = vector.broadcast %c2_i32_91 : i32 to vector<1x128xi32>
      %224 = arith.cmpi eq, %0, %223 : vector<1x128xi32>
      %cst_92 = arith.constant 0.000000e+00 : f32
      %225 = vector.shape_cast %205 : vector<1x1xf32> to vector<1x1xf32>
      %226 = vector.broadcast %225 : vector<1x1xf32> to vector<1x128xf32>
      %227 = vector.broadcast %cst_92 : f32 to vector<1x128xf32>
      %228 = arith.select %224, %226, %227 : vector<1x128xi1>, vector<1x128xf32>
      %229 = arith.addf %222, %228 : vector<1x128xf32>
      %c3_i32_93 = arith.constant 3 : i32
      %230 = vector.broadcast %c3_i32_93 : i32 to vector<1x128xi32>
      %231 = arith.cmpi eq, %0, %230 : vector<1x128xi32>
      %cst_94 = arith.constant 0.000000e+00 : f32
      %232 = vector.shape_cast %197 : vector<1x1xf32> to vector<1x1xf32>
      %233 = vector.broadcast %232 : vector<1x1xf32> to vector<1x128xf32>
      %234 = vector.broadcast %cst_94 : f32 to vector<1x128xf32>
      %235 = arith.select %231, %233, %234 : vector<1x128xi1>, vector<1x128xf32>
      %236 = arith.addf %229, %235 : vector<1x128xf32>
      %c4_i32_95 = arith.constant 4 : i32
      %237 = vector.broadcast %c4_i32_95 : i32 to vector<1x128xi32>
      %238 = arith.cmpi eq, %0, %237 : vector<1x128xi32>
      %cst_96 = arith.constant 0.000000e+00 : f32
      %239 = vector.shape_cast %201 : vector<1x1xf32> to vector<1x1xf32>
      %240 = vector.broadcast %239 : vector<1x1xf32> to vector<1x128xf32>
      %241 = vector.broadcast %cst_96 : f32 to vector<1x128xf32>
      %242 = arith.select %238, %240, %241 : vector<1x128xi1>, vector<1x128xf32>
      %243 = arith.addf %236, %242 : vector<1x128xf32>
      %c0_97 = arith.constant 0 : index
      %c0_98 = arith.constant 0 : index
      %244 = vector.load %arg6[%c0_97, %c0_98] : memref<1x128xf32, #tpu.memory_space<vmem>>, vector<1x128xf32>
      tpu.vector_store %arg6[%c0_97, %c0_98], %243 {strides = array<i32>} : memref<1x128xf32, #tpu.memory_space<vmem>>, vector<1x128xf32>,
    } else {
    }
    return
  }
  func.func @transform_0(%arg0: i32) -> (i32, i32) {
    %c0_i32 = arith.constant 0 : i32
    %c0_i32_0 = arith.constant 0 : i32
    %c0_i32_1 = arith.constant 0 : i32
    return %c0_i32, %c0_i32_0 : i32, i32
  }
  func.func @transform_1(%arg0: i32) -> (i32, i32) {
    %c0_i32 = arith.constant 0 : i32
    %c0_i32_0 = arith.constant 0 : i32
    return %arg0, %c0_i32 : i32, i32
  }
  func.func @transform_2(%arg0: i32) -> (i32, i32) {
    %c0_i32 = arith.constant 0 : i32
    %c0_i32_0 = arith.constant 0 : i32
    return %arg0, %c0_i32 : i32, i32
  }
  func.func @transform_3(%arg0: i32) -> (i32, i32) {
    %c0_i32 = arith.constant 0 : i32
    %c0_i32_0 = arith.constant 0 : i32
    return %arg0, %c0_i32 : i32, i32
  }
  func.func @transform_5(%arg0: i32) -> (i32, i32) {
    %c0_i32 = arith.constant 0 : i32
    %c0_i32_0 = arith.constant 0 : i32
    %c0_i32_1 = arith.constant 0 : i32
    return %c0_i32, %c0_i32_0 : i32, i32
  }
}

</mosaic_0001>

<bundles_post_ra>
// kernel: tpu_custom_call.1
= control target key start
LH: loop header
LB: loop body
LE: loop exit
PB: predicated region body
PF: predicated region fallthrough
CT: control target
= control target key end

     0   :  { %s671_s0 = inlined_call_operand.<no memory space> [shape: f32[1,1], index: 0, kind: input, shape index: {}]   ;;  %s672_s1 = inlined_call_operand.hbm [shape: f32[8,128], index: 1, kind: input, shape index: {}]   ;;  %s673_s2 = inlined_call_operand.hbm [shape: f32[8,128], index: 2, kind: input, shape index: {}]   ;;  %s674_s3 = inlined_call_operand.vmem [shape: f32[8,128], index: 3, kind: input, shape index: {}]   ;;  %s675_s4 = inlined_call_operand.hbm [shape: f32[8,128], index: 4, kind: input, shape index: {}]   ;;  %s676_s5 = inlined_call_operand.hbm [shape: f32[1,128], index: 5, kind: output, shape index: {}]  }
   0x1   :  { %v10_v0 = vstv %s671_s0 }
   0x2   :  { %11 = vst [vmem:[#allocation7] sm:$0x1] %v10_v0 }
   0x3   :  { %12 = vsyncpa [#allocation9], 0 }
   0x4   :  { %13 = vsyncpa [#allocation12], 0 }
   0x5   :  { %14 = vsyncpa [#allocation10], 0  ;;  %s515_s20 = smov [#allocation8]   ;;  %s516_s22 = smov [#allocation11]  }
   0x6   :  { %s23_s21 = sshll.u32 %s515_s20, 4  ;;  %s33_s23 = sshll.u32 %s516_s22, 4  ;;  %s24_s21 = int_to_ptr.vmem [resolvable:$true] %s23_s21  ;;  %s34_s23 = int_to_ptr.vmem [resolvable:$true] %s33_s23 }
   0x7   :  { %s419_s26 = scalar_lea.hbm %s672_s1, 128 }
   0x8   :  { %p420_p0 = scmp.ne.s32.totalorder %s672_s1, %s419_s26  ;;  %p423_p1 = scmp.lt.u32.totalorder %s419_s26, %s672_s1 }
   0xa   :  { %p425_p2 = pnand %p423_p1, %p420_p0 }
   0xc   :  { %428 = shalt.err (!%p425_p2)
}
   0xd   :  { %s429_s30 = scalar_lea.vmem %s24_s21, 128  ;;  %p434_p4 = scmp.lt.s32.totalorder %s24_s21, %s24_s21 }
   0xe   :  { %p430_p3 = scmp.ne.s32.totalorder %s24_s21, %s429_s30  ;;  %p435_p5 = scmp.lt.s32.totalorder %s429_s30, %s429_s30 }
  0x10   :  { %p436_p6 = por %p435_p5, %p434_p4 }
  0x12   :  { %p437_p7 = pnand %p436_p6, %p430_p3 }
  0x14   :  { %440 = shalt.err (!%p437_p7)
}
  0x15   :  { %26 = dma.hbm_to_vmem [thread:$0]  %s672_s1, 128, %s24_s21, [#allocation9]  }
  0x16   :  { %s441_s10 = scalar_lea.hbm %s673_s2, 128 }
  0x17   :  { %p442_p8 = scmp.ne.s32.totalorder %s673_s2, %s441_s10  ;;  %p445_p9 = scmp.lt.u32.totalorder %s441_s10, %s673_s2 }
  0x19   :  { %p447_p10 = pnand %p445_p9, %p442_p8 }
  0x1b   :  { %450 = shalt.err (!%p447_p10)
}
  0x1c   :  { %s451_s15 = scalar_lea.vmem %s34_s23, 128  ;;  %p456_p12 = scmp.lt.s32.totalorder %s34_s23, %s34_s23 }
  0x1d   :  { %p452_p11 = scmp.ne.s32.totalorder %s34_s23, %s451_s15  ;;  %p457_p13 = scmp.lt.s32.totalorder %s451_s15, %s451_s15 }
  0x1f   :  { %p458_p0 = por %p457_p13, %p456_p12 }
  0x21   :  { %p459_p1 = pnand %p458_p0, %p452_p11 }
  0x23   :  { %462 = shalt.err (!%p459_p1)
}
  0x24   :  { %36 = dma.hbm_to_vmem [thread:$0]  %s673_s2, 128, %s34_s23, [#allocation12]  }
  0x25   :  { %507 = dma.done.wait [#allocation9], 128  }
  0x26   :  { %508 = vsyncadd [#allocation9], 4294967168 }
  0x27   :  { %509 = dma.done.wait [#allocation12], 128  }
  0x28   :  { %510 = vsyncadd [#allocation12], 4294967168  ;;  %v46_v1 = vlaneseq  ;;  %s517_s17 = smov [#allocation2]   ;;  %s463_s21 = scalar_lea.hbm %s675_s4, 128 }
  0x29   :  { %s59_s18 = sshll.u32 %s517_s17, 4  ;;  %p464_p2 = scmp.ne.s32.totalorder %s675_s4, %s463_s21  ;;  %s60_s18 = int_to_ptr.vmem [resolvable:$true] %s59_s18 }
  0x2a   :  { %v581_v2 = vand.u32 127, %v46_v1  ;;  %p467_p3 = scmp.lt.u32.totalorder %s463_s21, %s675_s4 }
  0x2c   :  { %p469_p4 = pnand %p467_p3, %p464_p2 }
  0x2e   :  { %472 = shalt.err (!%p469_p4)  }
  0x2f   :  { %s473_s25 = scalar_lea.vmem %s60_s18, 128  ;;  %p478_p6 = scmp.lt.s32.totalorder %s60_s18, %s60_s18 }
  0x30   :  { %p474_p5 = scmp.ne.s32.totalorder %s60_s18, %s473_s25  ;;  %p479_p7 = scmp.lt.s32.totalorder %s473_s25, %s473_s25 }
  0x32   :  { %p480_p8 = por %p479_p7, %p478_p6 }
  0x34   :  { %p481_p9 = pnand %p480_p8, %p474_p5 }
  0x36   :  { %484 = shalt.err (!%p481_p9)  }
  0x37   :  { %62 = dma.hbm_to_vmem [thread:$0]  %s675_s4, 128, %s60_s18, [#allocation6] }
  0x38   :  { %511 = dma.done.wait [#allocation6], 128 }
  0x39   :  { %512 = vsyncadd [#allocation6], 4294967168  ;;  %v518_v3 = vmov 0   ;;  %v66_v4 = vld [vmem:[#allocation2] sm:$0xff]  ;;  %v82_v5 = vld [vmem:[#allocation8] sm:$0xff]  ;;  %v519_v13 = vmov 0.0  }
  0x3a   :  { %399 = vset.pattern.permute.xlu1 %v518_v3  ;;  %400 = vset.pattern.permute.xlu0 %v518_v3  ;;  %v67_v6 = vmul.f32 %v66_v4, %v66_v4  ;;  %v380_v7 = vld [vmem:[#allocation7] ss:$0 sm:$0xff]  ;;  %v83_v8 = vmul.f32 %v82_v5, %v82_v5  ;;  %v89_v9 = vld [vmem:[#allocation11] sm:$0xff]  ;;  %v96_v11 = vld [vmem:[%s674_s3] sm:$0xff]  ;;  %80 = vst [vmem:[#allocation13] sm:$0x1] %v519_v13 }
  0x3b   :  { %112 = vperm.xlu1 %399, %v380_v7   ;;  %v90_v10 = vmul.f32 %v89_v9, %v89_v9  ;;  %v97_v12 = vmul.f32 %v96_v11, %v96_v11  ;;  %385 = vmatprep.subr.bf16.mxu0 %v519_v13  ;;  %vm520_vm0 = vmmov 0   ;;  %vm78_vm1 = vcmask 0   ;;  %s522_s3 = smov [#allocation13]  }
  0x3c   :  { %68 = vadd.xlane.f32.xlu0 %v67_v6  ;;  %387 = vmatprep.mubr.msk.bf16.mxu0 %vm520_vm0, %v519_v13  ;;  %v521_v27 = vmov -inf   ;;  %v159_v32 = vshrl.u32 %v46_v1, 7  ;;  %vm164_vm2 = vcmask 64512   ;;  %vm76_vm4 = vcmask 57344   ;;  %s364_s4 = sshll.u32 %s522_s3, 4  ;;  %s365_s4 = int_to_ptr.vmem [resolvable:$true] %s364_s4 }
  0x3d   :  { %79 = vst.msk [vmem:[#allocation5] sm:$0x1] %vm78_vm1, %v521_v27  ;;  %vm240_vm6 = vcmp.eq.s32.totalorder %v581_v2, 0  ;;  %vm248_vm7 = vcmp.eq.s32.totalorder %v581_v2, 1  ;;  %vm257_vm8 = vcmp.eq.s32.totalorder %v581_v2, 2  ;;  %vm266_vm9 = vcmp.eq.s32.totalorder %v581_v2, 3  ;;  %p490_p11 = scmp.lt.s32.totalorder %s365_s4, %s365_s4 }
  0x3e   :  { %vm162_vm3 = vcmp.eq.s32.totalorder %v581_v2, %v159_v32  ;;  %77 = vst.msk [vmem:[#allocation4] sm:$0x1] %vm76_vm4, %v519_v13  ;;  %v608_v58 = vsub.s32 0, %v159_v32  ;;  %vm275_vm10 = vcmp.eq.s32.totalorder %v581_v2, 4  ;;  %vm292_vm11 = vcmask 1040384   ;;  %s485_s0 = scalar_lea.vmem %s365_s4, 16 }
  0x3f   :  { %p486_p10 = scmp.ne.s32.totalorder %s365_s4, %s485_s0  ;;  %s489_s30 = scalar_lea.vmem %s365_s4, 32 }
  0x40   :  { %84 = vadd.xlane.f32.xlu0 %v83_v8  ;;  %p491_p12 = scmp.lt.s32.totalorder %s489_s30, %s485_s0 }
  0x42   :  { %p492_p13 = por %p491_p12, %p490_p11 }
  0x44   :  { %91 = vadd.xlane.f32.xlu0 %v90_v10  ;;  %v189_v56 = vld [vmem:[#allocation5] sm:$0x1]  ;;  %p493_p0 = pnand %p492_p13, %p486_p10 }
  0x48   :  { %98 = vadd.xlane.f32.xlu0 %v97_v12 }
  0xba   :  { %v113_v23 = vpop.permute.xlu1 %112 }
  0xc9   :  { %v69_v14 = vpop.xlane.xlu0 %68 }
  0xca   :  { %v70_v15 = vmax.f32 %v69_v14, 1e-24 }
  0xcc   :  { %401 = vrsqrt.f32 %v70_v15 }
  0xcd   :  { %v85_v16 = vpop.xlane.xlu0 %84 }
  0xce   :  { %v86_v17 = vmax.f32 %v85_v16, 1e-24 }
  0xd0   :  { %403 = vrsqrt.f32 %v86_v17 }
  0xd1   :  { %v92_v28 = vpop.xlane.xlu0 %91 }
  0xd2   :  { %v93_v29 = vmax.f32 %v92_v28, 1e-24 }
  0xd4   :  { %405 = vrsqrt.f32 %v93_v29 }
  0xd5   :  { %v99_v30 = vpop.xlane.xlu0 %98 }
  0xd6   :  { %v402_v18 = vpop.eup %401  ;;  %v100_v31 = vmax.f32 %v99_v30, 1e-24 }
  0xd7   :  { %v72_v19 = vmul.f32 %v402_v18, %v66_v4 }
  0xd8   :  { %407 = vrsqrt.f32 %v100_v31 }
  0xd9   :  { %73 = vst [vmem:[#allocation2] sm:$0xff] %v72_v19  ;;  %v74_v20 = vpack.c.bf16 %v72_v19, %v72_v19 }
  0xda   :  { %v404_v21 = vpop.eup %403 }
  0xdb   :  { %75 = vst [vmem:[#allocation3] sm:$0xf] %v74_v20  ;;  %v88_v22 = vmul.f32 %v404_v21, %v82_v5 }
  0xdd   :  { %v115_v25 = vmul.f32 %v113_v23, %v88_v22 }
  0xde   :  { %v406_v33 = vpop.eup %405 }
  0xdf   :  { %v116_v26 = vpack.c.bf16 %v115_v25, %v115_v25  ;;  %v95_v35 = vmul.f32 %v406_v33, %v89_v9 }
  0xe1   :  { %v232_v42 = vsub.f32 %v88_v22, %v95_v35 }
  0xe2   :  { %v117_v24 = vld [vmem:[#allocation3] sm:$0xf]  ;;  %v408_v36 = vpop.eup %407 }
  0xe3   :  { %386 = vmatpush3.bf16.xpose.msra.mxu0 %v117_v24  ;;  %v102_v43 = vmul.f32 %v408_v36, %v96_v11  ;;  %v234_v45 = vmul.f32 %v232_v42, %v232_v42 }
  0xe5   :  { %v233_v46 = vsub.f32 %v72_v19, %v102_v43 }
  0xe7   :  { %v237_v47 = vmul.f32 %v233_v46, %v233_v46 }
  0xea   :  { %388 = vmatmul.mubr.bf16.vlgmr.msra.gmra.mrb[0].mxu0 %v116_v26 }
 0x1bd   :  { %v152_v34 = vpop.f32.mrb[0].mxu0 }
 0x1be   :  { %v389_v37 = vpop.f32.mrb[1].mxu0  ;;  %v168_v38 = vsel %vm164_vm2, %v152_v34, -inf  ;;  %v163_v40 = vsel %vm162_vm3, %v152_v34, 0.0 }
 0x1bf   :  { %169 = vmax.xlane.f32.xlu1 %v168_v38  ;;  %v155_v39 = vpop.f32.mrb[2].mxu0  ;;  %v165_v44 = vsel %vm164_vm2, %v163_v40, 0.0  ;;  %v200_v40 = vld [vmem:[#allocation4] sm:$0x1] }
 0x1c0   :  { %v390_v41 = vpop.f32.mrb[3].mxu0 }
 0x1c3   :  { %166 = vadd.xlane.f32.xlu1 %v165_v44 }
 0x1c7   :  { %235 = vadd.xlane.f32.xlu1 %v234_v45 }
 0x1cb   :  { %238 = vadd.xlane.f32.xlu1 %v237_v47 }
 0x24c   :  { %v170_v48 = vpop.xlane.xlu1 %169 }
 0x24d   :  { %v171_v49 = vsub.f32 %v152_v34, %v170_v48  ;;  %v183_v50 = vrot.slane %v170_v48, 4 }
 0x24f   :  { %v184_v51 = vmax.f32 %v170_v48, %v183_v50  ;;  %v172_v52 = vmul.f32 1.442695, %v171_v49 }
 0x250   :  { %v167_v7 = vpop.xlane.xlu1 %166 }
 0x251   :  { %v185_v53 = vrot.slane %v184_v51, 2  ;;  %409 = vpow2.f32 %v172_v52  ;;  %vm180_vm5 = vcmp.ge.f32.partialorder %v167_v7, %v170_v48  ;;  %v249_v11 = vrot.slane %v167_v7, 4 }
 0x252   :  { %v381_v10 = vsel %vm180_vm5, 1.0, %v519_v13 }
 0x253   :  { %v186_v54 = vmax.f32 %v184_v51, %v185_v53  ;;  %v258_v12 = vrot.slane %v381_v10, 4  ;;  %v250_v15 = vadd.f32 %v249_v11, %v167_v7 }
 0x254   :  { %v236_v9 = vpop.xlane.xlu1 %235 }
 0x255   :  { %v187_v55 = vrot.slane %v186_v54, 1  ;;  %v267_v16 = vrot.slane %v236_v9, 4  ;;  %v259_v18 = vadd.f32 %v381_v10, %v258_v12  ;;  %v251_v23 = vrot.slane %v250_v15, 2 }
 0x257   :  { %v188_v57 = vmax.f32 %v186_v54, %v187_v55  ;;  %v268_v24 = vadd.f32 %v267_v16, %v236_v9  ;;  %v260_v27 = vrot.slane %v259_v18, 2  ;;  %v252_v31 = vadd.f32 %v251_v23, %v250_v15 }
 0x258   :  { %v239_v14 = vpop.xlane.xlu1 %238 }
 0x259   :  { %v190_v59 = vmax.f32 %v189_v56, %v188_v57  ;;  %v276_v20 = vrot.slane %v239_v14, 4  ;;  %v269_v32 = vrot.slane %v268_v24, 2  ;;  %v261_v35 = vadd.f32 %v260_v27, %v259_v18 }
 0x25a   :  { %v253_v41 = vrot.slane %v252_v31, 1 }
 0x25b   :  { %v410_v60 = vpop.eup %409  ;;  %v201_v61 = vsub.f32 %v189_v56, %v190_v59  ;;  %231 = vst.msk [vmem:[#allocation5] sm:$0x1] %vm78_vm1, %v190_v59  ;;  %v195_v62 = vrot.slane %v190_v59, %v608_v58  ;;  %v277_v28 = vadd.f32 %v276_v20, %v239_v14  ;;  %v270_v42 = vadd.f32 %v269_v32, %v268_v24 }
 0x25c   :  { %v174_v63 = vsel %vm164_vm2, %v410_v60, 0.0  ;;  %v262_v45 = vrot.slane %v261_v35, 1  ;;  %v254_v50 = vadd.f32 %v253_v41, %v252_v31 }
 0x25d   :  { %v202_v0 = vmul.f32 1.442695, %v201_v61  ;;  %175 = vadd.xlane.f32.xlu0 %v174_v63  ;;  %v197_v1 = vsub.f32 %v170_v48, %v195_v62  ;;  %v278_v36 = vrot.slane %v277_v28, 2  ;;  %v271_v51 = vrot.slane %v270_v42, 1 }
 0x25e   :  { %v263_v54 = vadd.f32 %v262_v45, %v261_v35 }
 0x25f   :  { %411 = vpow2.f32 %v202_v0  ;;  %v198_v3 = vmul.f32 1.442695, %v197_v1  ;;  %v279_v46 = vadd.f32 %v278_v36, %v277_v28  ;;  %v272_v57 = vadd.f32 %v271_v51, %v270_v42 }
 0x260   :  { %v264_v63 = vsel %vm257_vm8, %v263_v54, 0.0 }
 0x261   :  { %413 = vpow2.f32 %v198_v3  ;;  %v280_v55 = vrot.slane %v279_v46, 1  ;;  %v273_v1 = vsel %vm266_vm9, %v272_v57, 0.0 }
 0x262   :  { %v315_v6 = vld [vmem:[#allocation5] sm:$0x1] }
 0x263   :  { %v281_v62 = vadd.f32 %v280_v55, %v279_v46 }
 0x269   :  { %v412_v4 = vpop.eup %411 }
 0x26a   :  { %206 = vperm.xlu1 %399, %v412_v4  }
 0x26b   :  { %v414_v5 = vpop.eup %413 }
 0x273   :  { %216 = vperm.xlu0 %400, %v414_v5   ;;  %v282_v5 = vsel %vm275_vm10, %v281_v62, 0.0 }
 0x277   :  { %318 = vperm.xlu0 %400, %v315_v6   ;;  %v284_v6 = vld [vmem:[#allocation13] sm:$0x1] }
 0x2e9   :  { %v207_v30 = vpop.permute.xlu1 %206 }
 0x2ea   :  { %v176_v8 = vpop.xlane.xlu0 %175  ;;  %v212_v37 = vrot.slane %v207_v30, %v608_v58 }
 0x2eb   :  { %415 = vlog2.f32 %v176_v8 }
 0x2ec   :  { %v213_v47 = vmul.f32 %v212_v37, %v200_v40 }
 0x2f2   :  { %v217_v17 = vpop.permute.xlu0 %216 }
 0x2f3   :  { %v219_v19 = vmul.f32 %v410_v60, %v217_v17  ;;  %v255_v60 = vsel %vm248_vm7, %v254_v50, 0.0 }
 0x2f5   :  { %v416_v21 = vpop.eup %415  ;;  %v220_v22 = vsel %vm164_vm2, %v219_v19, 0.0 }
 0x2f6   :  { %v178_v25 = vmul.f32 0.6931472, %v416_v21  ;;  %v221_v26 = vrot.slane %v220_v22, 4  ;;  %v319_v9 = vpop.permute.xlu0 %318 }
 0x2f7   :  { %v324_v12 = vrot.slane %v319_v9, %v608_v58 }
 0x2f8   :  { %v179_v29 = vadd.f32 %v178_v25, %v170_v48  ;;  %v222_v13 = vadd.f32 %v221_v26, %v220_v22 }
 0x2fa   :  { %v241_v33 = vrot.slane %v179_v29, 4  ;;  %v223_v34 = vrot.slane %v222_v13, 2 }
 0x2fc   :  { %v242_v38 = vadd.f32 %v241_v33, %v179_v29  ;;  %v224_v39 = vadd.f32 %v223_v34, %v222_v13 }
 0x2fe   :  { %v243_v43 = vrot.slane %v242_v38, 2  ;;  %v225_v44 = vrot.slane %v224_v39, 1 }
 0x300   :  { %v244_v48 = vadd.f32 %v243_v43, %v242_v38  ;;  %v226_v49 = vadd.f32 %v225_v44, %v224_v39 }
 0x302   :  { %v245_v52 = vrot.slane %v244_v48, 1  ;;  %v227_v53 = vadd.f32 %v226_v49, %v213_v47 }
 0x304   :  { %229 = vst.msk [vmem:[#allocation4] sm:$0x1] %vm76_vm4, %v227_v53  ;;  %v246_v56 = vadd.f32 %v245_v52, %v244_v48 }
 0x306   :  { %v247_v59 = vsel %vm240_vm6, %v246_v56, 0.0 }
 0x307   :  { %v256_v61 = vadd.f32 %v255_v60, %v247_v59 }
 0x309   :  { %v265_v0 = vadd.f32 %v264_v63, %v256_v61 }
 0x30b   :  { %v274_v3 = vadd.f32 %v273_v1, %v265_v0  ;;  %v312_v4 = vld [vmem:[#allocation4] sm:$0x1] }
 0x30c   :  { %417 = vlog2.f32 %v312_v4 }
 0x30d   :  { %v283_v7 = vadd.f32 %v282_v5, %v274_v3 }
 0x30f   :  { %v285_v8 = vadd.f32 %v284_v6, %v283_v7 }
 0x311   :  { %286 = vst [vmem:[#allocation13] sm:$0x1] %v285_v8 }
 0x316   :  { %v418_v10 = vpop.eup %417 }
 0x317   :  { %v314_v11 = vmul.f32 0.6931472, %v418_v10 }
 0x318   :  { %v290_v14 = vld [vmem:[#allocation13] sm:$0x1] }
 0x319   :  { %v296_v15 = vsel %vm248_vm7, %v290_v14, 0.0  ;;  %v291_v16 = vsel %vm240_vm6, %v290_v14, 0.0  ;;  %v325_v19 = vadd.f32 %v324_v12, %v314_v11  ;;  %v304_v20 = vsel %vm266_vm9, %v290_v14, 0.0 }
 0x31a   :  { %v297_v17 = vsel %vm292_vm11, %v296_v15, 0.0  ;;  %v293_v18 = vsel %vm292_vm11, %v291_v16, 0.0  ;;  %v305_v21 = vsel %vm292_vm11, %v304_v20, 0.0  ;;  %v308_v22 = vsel %vm275_vm10, %v290_v14, 0.0 }
 0x31b   :  { %298 = vadd.xlane.f32.xlu1 %v297_v17  ;;  %294 = vadd.xlane.f32.xlu0 %v293_v18  ;;  %v326_v58 = vsel %vm76_vm4, %v325_v19, 0.0  ;;  %v309_v23 = vsel %vm292_vm11, %v308_v22, 0.0  ;;  %v300_v24 = vsel %vm257_vm8, %v290_v14, 0.0 }
 0x31c   :  { %v301_v25 = vsel %vm292_vm11, %v300_v24, 0.0 }
 0x31f   :  { %306 = vadd.xlane.f32.xlu0 %v305_v21  ;;  %327 = vadd.xlane.f32.xlu1 %v326_v58 }
 0x323   :  { %310 = vadd.xlane.f32.xlu0 %v309_v23 }
 0x327   :  { %302 = vadd.xlane.f32.xlu0 %v301_v25 }
 0x3a8   :  { %v299_v26 = vpop.xlane.xlu1 %298  ;;  %v295_v27 = vpop.xlane.xlu0 %294 }
 0x3a9   :  { %v330_v28 = vmul.f32 0.125, %v299_v26  ;;  %v331_v29 = vmul.f32 0.125, %v295_v27 }
 0x3ab   :  { %v332_v33 = vsub.f32 %v331_v29, %v330_v28 }
 0x3ac   :  { %v328_v13 = vpop.xlane.xlu1 %327  ;;  %v307_v30 = vpop.xlane.xlu0 %306 }
 0x3ad   :  { %v333_v31 = vmul.f32 0.125, %v328_v13  ;;  %v337_v32 = vmul.f32 0.125, %v307_v30 }
 0x3af   :  { %v334_v34 = vsub.f32 %v333_v31, %v330_v28  ;;  %vm339_vm12 = vcmp.gt.f32.partialorder %v337_v32, 0.5 }
 0x3b0   :  { %v311_v35 = vpop.xlane.xlu0 %310  ;;  %v340_v38 = vsel %vm339_vm12, 0.0, %v337_v32 }
 0x3b1   :  { %v335_v36 = vadd.f32 %v334_v34, %v332_v33  ;;  %v338_v37 = vmul.f32 0.125, %v311_v35  ;;  %v353_v52 = vsel %vm266_vm9, %v340_v38, 0.0 }
 0x3b3   :  { %vm341_vm13 = vcmp.gt.f32.partialorder %v338_v37, 0.5  ;;  %v336_v41 = vmul.f32 0.5, %v335_v36 }
 0x3b4   :  { %v342_v39 = vsel %vm341_vm13, 0.0, %v338_v37  ;;  %v303_v40 = vpop.xlane.xlu0 %302 }
 0x3b5   :  { %v343_v42 = vadd.f32 %v342_v39, %v340_v38  ;;  %v346_v43 = vmul.f32 100.0, %v303_v40  ;;  %v348_v47 = vsel %vm240_vm6, %v336_v41, 0.0  ;;  %v355_v54 = vsel %vm275_vm10, %v342_v39, 0.0 }
 0x3b7   :  { %v344_v44 = vmul.f32 0.5, %v343_v42  ;;  %v347_v45 = vmul.f32 0.125, %v346_v43 }
 0x3b9   :  { %v345_v46 = vsub.f32 %v336_v41, %v344_v44  ;;  %v349_v48 = vsel %vm248_vm7, %v347_v45, 0.0 }
 0x3ba   :  { %v350_v49 = vadd.f32 %v349_v48, %v348_v47 }
 0x3bb   :  { %v351_v50 = vsel %vm257_vm8, %v345_v46, 0.0 }
 0x3bc   :  { %v352_v51 = vadd.f32 %v351_v50, %v350_v49 }
 0x3be   :  { %v354_v53 = vadd.f32 %v353_v52, %v352_v51 }
 0x3c0   :  { %v356_v55 = vadd.f32 %v355_v54, %v354_v53 }
 0x3c2   :  { %357 = vst [vmem:[#allocation13] sm:$0x1] %v356_v55 }
 0x3c3   :  { %496 = shalt.err (!%p493_p0)
}
 0x3c4   :  { %s497_s8 = scalar_lea.hbm %s676_s5, 16 }
 0x3c5   :  { %p498_p1 = scmp.ne.s32.totalorder %s676_s5, %s497_s8  ;;  %p501_p2 = scmp.lt.u32.totalorder %s497_s8, %s676_s5 }
 0x3c7   :  { %p503_p3 = pnand %p501_p2, %p498_p1 }
 0x3c9   :  { %506 = shalt.err (!%p503_p3)
}
 0x3ca   :  { %367 = dma.vmem_to_hbm [thread:$0]  %s365_s4, 16, %s676_s5, [#allocation10]  }
 0x3cb   :  { %513 = dma.done.wait [#allocation10], 16  }
 0x3cc   :  { %514 = vsyncadd [#allocation10], 4294967280 }
 0x3cd   :  { %371 = vsyncpa [#allocation9], 1 }
 0x3ce   :  { %372 = vsyncpa [#allocation12], 1 }
 0x3cf   :  { %373 = vsyncpa [#allocation10], 1 }
 0x3d0   :  { %374 = vsyncmov [#allocation6] }
 0x3d3   :  { %s375_s15 = vpop.sfrf %374 }
 0x3d4   :  { %p382_p4 = scmp.ne.s32.totalorder %s375_s15, 0 }
 0x3d6   :  { %379 = shalt.err (%p382_p4)  }

</bundles_post_ra>
